<compile_context>
chip_gen: v7x
topology: tpu7x:2x2x1
jax: 0.10.0
libtpu: 0.0.40
codegen_flags: <defaults>
</compile_context>

<pallas_src>
import functools

import jax
import jax.numpy as jnp
from jax.experimental import pallas as pl
from jax.experimental.pallas import tpu as pltpu

LN_EPS = 1e-5  # PyTorch nn.LayerNorm default


def _round_up(x, m):
    return (x + m - 1) // m * m


@functools.lru_cache(maxsize=1)
def _vmem_capacity_bytes():
    """Physical VMEM per TensorCore; conservative fallback if the query fails."""
    try:
        return int(pltpu.get_tpu_info().vmem_capacity_bytes)
    except Exception:
        return 64 << 20  # v7x per-TensorCore VMEM (smallest of the fleet)


# --------------------------------------------------------------------------- #
# Kernel
# --------------------------------------------------------------------------- #
def _linear_relu_ln_kernel(x_ref, w_ref, b_ref, g_ref, beta_ref, o_ref,
                           acc_ref, *, inv_n):
    """Fused Linear + ReLU + LayerNorm.

    x_ref:    (TM, TK)         activation tile (native dtype)
    w_ref:    (TK, CoutP)      weight tile, (Cin, Cout) layout (native dtype)
    b_ref:    (1, CoutP)  f32  linear bias      (zero in padded columns)
    g_ref:    (1, CoutP)  f32  LayerNorm gamma  (zero in padded columns)
    beta_ref: (1, CoutP)  f32  LayerNorm beta   (zero in padded columns)
    o_ref:    (TM, CoutP)      output tile
    acc_ref:  (TM, CoutP) f32  accumulator scratch, reused by the epilogue
    inv_n:    1 / real_Cout    compile-time constant
    """
    k = pl.program_id(1)

    @pl.when(k == 0)
    def _():
        acc_ref[...] = jnp.zeros_like(acc_ref)

    # MXU: natural (TM, TK) . (TK, CoutP) -> (TM, CoutP), f32 accumulation.
    acc_ref[...] += jnp.dot(x_ref[...], w_ref[...],
                            preferred_element_type=jnp.float32)

    @pl.when(k == pl.num_programs(1) - 1)
    def _():
        # Bias + ReLU; write back into acc_ref so the live (TM, CoutP) f32
        # value stays in the scratch buffer across the cross-lane reductions
        # (no extra VMEM temporary inflating the high-water mark).
        acc_ref[...] = jnp.maximum(acc_ref[...] + b_ref[...], 0.0)
        y = acc_ref[...]
        # Padded columns are exactly 0 post-ReLU (zero weight cols + zero
        # bias), so plain sums over the padded tile equal sums over the real
        # Cout columns; scale by 1/real_Cout.
        s = jnp.sum(y, axis=-1, keepdims=True)          # XLU
        sq = jnp.sum(y * y, axis=-1, keepdims=True)     # XLU
        mean = s * inv_n
        var = jnp.maximum(sq * inv_n - mean * mean, 0.0)  # biased var, clamped
        inv_std = jax.lax.rsqrt(var + LN_EPS)             # EUP
        o_ref[...] = ((y - mean) * inv_std * g_ref[...]
                      + beta_ref[...]).astype(o_ref.dtype)


# --------------------------------------------------------------------------- #
# Tiling selection
# --------------------------------------------------------------------------- #
def _choose_tiles(m_rows, cin, cout_p, x_bytes, w_bytes, o_bytes, budget,
                  forced_tm=None, forced_tk=None):
    """Return (tile_m, tile_k, vmem_need_bytes)."""

    def need(tm, tk):
        return (2 * tk * cout_p * w_bytes      # weight (pipeline double-buffer)
                + 2 * tm * tk * x_bytes        # x tile (double-buffered)
                + 2 * tm * cout_p * o_bytes    # out tile (double-buffered)
                + tm * cout_p * 4              # f32 accumulator (epilogue reuses it)
                + 3 * 2 * cout_p * 4)          # bias / gamma / beta

    if forced_tm is not None and forced_tk is not None:
        return forced_tm, forced_tk, need(forced_tm, forced_tk)

    m_cap = _round_up(max(m_rows, 8), 8)
    if m_rows >= 16:
        # Keep >=2 M tiles so the "parallel" axis can shard across both v7x
        # TensorCores (and BlockSpec pipelining has something to overlap).
        m_cap = min(m_cap, _round_up(pl.cdiv(m_rows, 2), 8))
    if forced_tm is not None:
        m_cands = [forced_tm]
    else:
        m_cands = [t for t in (1024, 512, 256, 128, 64, 32, 16, 8) if t <= m_cap]
        m_cands = m_cands or [m_cap]

    def pick_tm(tk, tm_floor):
        for tm in m_cands:
            if tm >= tm_floor and need(tm, tk) <= budget:
                return tm
        return None

    # 1) Weight-resident path: tile_k = Cin -> single K step; constant weight
    #    block index means the weight is DMA'd exactly once for the whole
    #    grid, and the activations need no Cin padding.
    if forced_tk is None or forced_tk == cin:
        tm = pick_tm(cin, tm_floor=min(128, m_cands[0]))
        if tm is not None:
            return tm, cin, need(tm, cin)
        if forced_tk == cin:
            return m_cands[-1], cin, need(m_cands[-1], cin)

    # 2) K-tiled reduction (very large Cin x Cout).  Prefer a tile_k that
    #    divides Cin so the activations never get padded/copied in HBM.
    if forced_tk is not None:
        tk = forced_tk
    else:
        for tk in (512, 384, 256, 128):
            if cin % tk == 0:
                break
        else:
            tk = 512 if cin > 512 else _round_up(cin, 128)
    tm = pick_tm(tk, tm_floor=8)
    if tm is None:
        # TODO(synk): add Cout (N) tiling with a two-stage LayerNorm reduction
        # for weights whose single K slice exceeds the VMEM budget.
        tm = m_cands[-1]
    return tm, tk, need(tm, tk)


# --------------------------------------------------------------------------- #
# Wrapper
# --------------------------------------------------------------------------- #
@functools.partial(jax.jit, static_argnames=("tile_m", "tile_k"))
def linear_layer_forward(x, w, b, gamma, beta, *, tile_m=None, tile_k=None):
    """x: (..., Cin) -> (..., Cout). Params use PyTorch shapes:
    w: (Cout, Cin), b: (Cout,), gamma/beta: (Cout,)."""
    orig_shape = x.shape
    cin = orig_shape[-1]
    cout = w.shape[0]
    x2 = x.reshape(-1, cin)
    m_rows = x2.shape[0]

    # ---- static padding / tiling decisions --------------------------------
    # No Cout padding when already lane-aligned (avoids the output slice
    # copy); otherwise pad to a multiple of 256 to fill the 256-wide MXU
    # columns on v6e/v7x (padded columns are zero -> only zero work).
    cout_p = cout if cout % 128 == 0 else _round_up(cout, 256)

    cap = _vmem_capacity_bytes()
    budget = cap // 2
    x_bytes = x.dtype.itemsize
    w_bytes = w.dtype.itemsize
    o_bytes = x.dtype.itemsize
    tile_m, tile_k, vmem_need = _choose_tiles(
        m_rows, cin, cout_p, x_bytes, w_bytes, o_bytes, budget,
        forced_tm=tile_m, forced_tk=tile_k)
    if vmem_need > cap - (8 << 20):
        raise ValueError(
            f"Requested tiling needs ~{vmem_need >> 20} MiB VMEM but this chip "
            f"has only {cap >> 20} MiB per TensorCore; pass smaller "
            f"tile_m / tile_k.")
    vmem_limit = max(int(vmem_need * 1.25) + (2 << 20), 32 << 20)
    vmem_limit = min(vmem_limit, cap - (8 << 20))

    cin_p = _round_up(cin, tile_k)

    # ---- weight layout + parameter padding --------------------------------
    # Transpose the PyTorch (Cout, Cin) weight to (Cin, Cout) so the kernel
    # runs the natural [TM,TK]x[TK,CoutP] MXU dot and weight K-slices are
    # contiguous rows.  (A production caller would keep the weight stored
    # pre-transposed; under jit the transpose fuses with the padding and is
    # amortized against the per-M-tile weight re-reads it removes.)
    wt = w.T
    if cout_p != cout:
        wt = jnp.pad(wt, ((0, 0), (0, cout_p - cout)))
        b = jnp.pad(b, (0, cout_p - cout))
        gamma = jnp.pad(gamma, (0, cout_p - cout))
        beta = jnp.pad(beta, (0, cout_p - cout))
    if cin_p != cin:
        # TODO(synk): handle the K remainder with an in-kernel masked last tile
        # instead of padding the activations in HBM.
        x2 = jnp.pad(x2, ((0, 0), (0, cin_p - cin)))
        wt = jnp.pad(wt, ((0, cin_p - cin), (0, 0)))

    b2 = b.astype(jnp.float32).reshape(1, cout_p)
    g2 = gamma.astype(jnp.float32).reshape(1, cout_p)
    beta2 = beta.astype(jnp.float32).reshape(1, cout_p)

    grid = (pl.cdiv(m_rows, tile_m), cin_p // tile_k)  # K (reduction) axis last

    kernel = functools.partial(_linear_relu_ln_kernel, inv_n=1.0 / cout)

    out = pl.pallas_call(
        kernel,
        out_shape=jax.ShapeDtypeStruct((m_rows, cout_p), x.dtype),
        grid_spec=pltpu.PrefetchScalarGridSpec(
            num_scalar_prefetch=0,
            grid=grid,
            in_specs=[
                pl.BlockSpec((tile_m, tile_k), lambda i, k: (i, k)),   # x
                pl.BlockSpec((tile_k, cout_p), lambda i, k: (k, 0)),   # w (Cin,Cout)
                pl.BlockSpec((1, cout_p), lambda i, k: (0, 0)),        # bias
                pl.BlockSpec((1, cout_p), lambda i, k: (0, 0)),        # gamma
                pl.BlockSpec((1, cout_p), lambda i, k: (0, 0)),        # beta
            ],
            out_specs=pl.BlockSpec((tile_m, cout_p), lambda i, k: (i, 0)),
            scratch_shapes=[pltpu.VMEM((tile_m, cout_p), jnp.float32)],
        ),
        compiler_params=pltpu.CompilerParams(
            dimension_semantics=("parallel", "arbitrary"),
            vmem_limit_bytes=vmem_limit,
        ),
    )(x2, wt, b2, g2, beta2)

    if cout_p != cout:
        out = out[:, :cout]
    return out.reshape(*orig_shape[:-1], cout)


# --------------------------------------------------------------------------- #
# Params, reference, tests
# --------------------------------------------------------------------------- #
def init_params(key, in_channels, out_channels):
    """PyTorch-style default init: Linear uniform(-1/sqrt(Cin), +), LN ones/zeros."""
    kw, kb = jax.random.split(key)
    bound = 1.0 / jnp.sqrt(in_channels)
    w = jax.random.uniform(kw, (out_channels, in_channels), jnp.float32,
                           minval=-bound, maxval=bound)
    b = jax.random.uniform(kb, (out_channels,), jnp.float32,
                           minval=-bound, maxval=bound)
    gamma = jnp.ones((out_channels,), jnp.float32)
    beta = jnp.zeros((out_channels,), jnp.float32)
    return w, b, gamma, beta


def _reference(x, w, b, gamma, beta):
    """Pure-JAX reference of Linear -> ReLU -> LayerNorm."""
    y = x @ w.T + b
    y = jnp.maximum(y, 0.0)
    mean = jnp.mean(y, axis=-1, keepdims=True)
    var = jnp.mean((y - mean) ** 2, axis=-1, keepdims=True)
    return (y - mean) / jnp.sqrt(var + LN_EPS) * gamma + beta


if __name__ == "__main__":
    key = jax.random.PRNGKey(0)

    # Test 1: small shapes matching the module spec (Cout=64 exercises the
    # lane-dense Cout padding path; weight-resident single-K path).
    k1, k2, key = jax.random.split(key, 3)
    batch, seq, in_channels, out_channels = 2, 8, 32, 64
    x = jax.random.normal(k1, (batch, seq, in_channels), jnp.float32)
    w, b, gamma, beta = init_params(k2, in_channels, out_channels)

    out = jax.block_until_ready(linear_layer_forward(x, w, b, gamma, beta))
    ref = _reference(x, w, b, gamma, beta)
    assert out.shape == (batch, seq, out_channels), out.shape
    assert jnp.allclose(out, ref, atol=1e-4, rtol=1e-4), float(
        jnp.max(jnp.abs(out - ref)))

    # Test 2: larger Cin/Cout; auto config picks the weight-resident path
    # (tile_k = Cin, no activation padding, Cout already lane-aligned).
    k3, k4, key = jax.random.split(key, 3)
    batch2, seq2, cin2, cout2 = 2, 64, 640, 256
    x2 = jax.random.normal(k3, (batch2, seq2, cin2), jnp.float32)
    w2, b2, g2, be2 = init_params(k4, cin2, cout2)

    out2 = jax.block_until_ready(linear_layer_forward(x2, w2, b2, g2, be2))
    ref2 = _reference(x2, w2, b2, g2, be2)
    assert out2.shape == (batch2, seq2, cout2), out2.shape
    assert jnp.allclose(out2, ref2, atol=1e-4, rtol=1e-4), float(
        jnp.max(jnp.abs(out2 - ref2)))

    # Test 3: force the K-tiled accumulation path (multi-step reduction axis)
    # to validate the fallback used when the weight cannot stay VMEM-resident.
    out3 = jax.block_until_ready(
        linear_layer_forward(x2, w2, b2, g2, be2, tile_m=32, tile_k=128))
    assert out3.shape == (batch2, seq2, cout2), out3.shape
    assert jnp.allclose(out3, ref2, atol=1e-4, rtol=1e-4), float(
        jnp.max(jnp.abs(out3 - ref2)))

    print("KERNEL_OK")
</pallas_src>

<mosaic_0001>
module attributes {stable_mosaic.version = 11 : i64} {
  func.func @_linear_relu_ln_kernel(%arg0: i32, %arg1: i32, %arg2: memref<8x32xf32, #tpu.memory_space<vmem>>, %arg3: memref<32x256xf32, #tpu.memory_space<vmem>>, %arg4: memref<1x256xf32, #tpu.memory_space<vmem>>, %arg5: memref<1x256xf32, #tpu.memory_space<vmem>>, %arg6: memref<1x256xf32, #tpu.memory_space<vmem>>, %arg7: memref<8x256xf32, #tpu.memory_space<vmem>>, %arg8: memref<8x256xf32, #tpu.memory_space<vmem>>) attributes {dimension_semantics = [#tpu.dimension_semantics<parallel>, #tpu.dimension_semantics<arbitrary>], iteration_bounds = array<i64: 2, 1>, scalar_prefetch = 0 : i64, scratch_operands = 1 : i64, tpu.core_type = #tpu.core_type<tc>, window_params = [{transform_indices = @transform_0, window_bounds = array<i64: 8, 32>}, {transform_indices = @transform_1, window_bounds = array<i64: 32, 256>}, {pipeline_mode = #tpu.pipeline_mode<synchronous>, transform_indices = @transform_2, window_bounds = array<i64: 1, 256>}, {pipeline_mode = #tpu.pipeline_mode<synchronous>, transform_indices = @transform_3, window_bounds = array<i64: 1, 256>}, {pipeline_mode = #tpu.pipeline_mode<synchronous>, transform_indices = @transform_4, window_bounds = array<i64: 1, 256>}, {transform_indices = @transform_5, window_bounds = array<i64: 8, 256>}]} {
    %c0_i32 = arith.constant 0 : i32
    %0 = arith.cmpi eq, %arg1, %c0_i32 : i32
    %1 = arith.extui %0 : i1 to i32
    %c0_i32_0 = arith.constant 0 : i32
    %2 = arith.cmpi ne, %1, %c0_i32_0 : i32
    scf.if %2 {
      %cst_10 = arith.constant 0.000000e+00 : f32
      %12 = vector.broadcast %cst_10 : f32 to vector<8x256xf32>
      %c0_11 = arith.constant 0 : index
      %c0_12 = arith.constant 0 : index
      %13 = vector.load %arg8[%c0_11, %c0_12] : memref<8x256xf32, #tpu.memory_space<vmem>>, vector<8x256xf32>
      tpu.vector_store %arg8[%c0_11, %c0_12], %12 {strides = array<i32>} : memref<8x256xf32, #tpu.memory_space<vmem>>, vector<8x256xf32>,
    } else {
    }
    %c0 = arith.constant 0 : index
    %c0_1 = arith.constant 0 : index
    %3 = vector.load %arg8[%c0, %c0_1] : memref<8x256xf32, #tpu.memory_space<vmem>>, vector<8x256xf32>
    %c0_2 = arith.constant 0 : index
    %c0_3 = arith.constant 0 : index
    %4 = vector.load %arg2[%c0_2, %c0_3] : memref<8x32xf32, #tpu.memory_space<vmem>>, vector<8x32xf32>
    %c0_4 = arith.constant 0 : index
    %c0_5 = arith.constant 0 : index
    %5 = vector.load %arg3[%c0_4, %c0_5] : memref<32x256xf32, #tpu.memory_space<vmem>>, vector<32x256xf32>
    %cst = arith.constant dense<0.000000e+00> : vector<8x256xf32>
    %6 = tpu.matmul %4, %5, %cst {dimension_numbers = #tpu.dot_dimension_numbers<[1], [0], [0], [1], [0, 0, 1, 1], [], []>} : vector<8x32xf32>, vector<32x256xf32>, vector<8x256xf32> -> vector<8x256xf32>
    %7 = arith.addf %3, %6 : vector<8x256xf32>
    %c0_6 = arith.constant 0 : index
    %c0_7 = arith.constant 0 : index
    %8 = vector.load %arg8[%c0_6, %c0_7] : memref<8x256xf32, #tpu.memory_space<vmem>>, vector<8x256xf32>
    tpu.vector_store %arg8[%c0_6, %c0_7], %7 {strides = array<i32>} : memref<8x256xf32, #tpu.memory_space<vmem>>, vector<8x256xf32>,
    %c0_i32_8 = arith.constant 0 : i32
    %9 = arith.cmpi eq, %arg1, %c0_i32_8 : i32
    %10 = arith.extui %9 : i1 to i32
    %c0_i32_9 = arith.constant 0 : i32
    %11 = arith.cmpi ne, %10, %c0_i32_9 : i32
    scf.if %11 {
      %c0_10 = arith.constant 0 : index
      %c0_11 = arith.constant 0 : index
      %12 = vector.load %arg8[%c0_10, %c0_11] : memref<8x256xf32, #tpu.memory_space<vmem>>, vector<8x256xf32>
      %c0_12 = arith.constant 0 : index
      %c0_13 = arith.constant 0 : index
      %13 = vector.load %arg4[%c0_12, %c0_13] : memref<1x256xf32, #tpu.memory_space<vmem>>, vector<1x256xf32>
      %14 = vector.broadcast %13 : vector<1x256xf32> to vector<8x256xf32>
      %15 = arith.addf %12, %14 : vector<8x256xf32>
      %cst_14 = arith.constant 0.000000e+00 : f32
      %16 = vector.broadcast %cst_14 : f32 to vector<8x256xf32>
      %17 = arith.maximumf %15, %16 : vector<8x256xf32>
      %c0_15 = arith.constant 0 : index
      %c0_16 = arith.constant 0 : index
      %18 = vector.load %arg8[%c0_15, %c0_16] : memref<8x256xf32, #tpu.memory_space<vmem>>, vector<8x256xf32>
      tpu.vector_store %arg8[%c0_15, %c0_16], %17 {strides = array<i32>} : memref<8x256xf32, #tpu.memory_space<vmem>>, vector<8x256xf32>,
      %c0_17 = arith.constant 0 : index
      %c0_18 = arith.constant 0 : index
      %19 = vector.load %arg8[%c0_17, %c0_18] : memref<8x256xf32, #tpu.memory_space<vmem>>, vector<8x256xf32>
      %cst_19 = arith.constant dense<0.000000e+00> : vector<8xf32>
      %20 = vector.multi_reduction <add>, %19, %cst_19 [1] : vector<8x256xf32> to vector<8xf32>
      %21 = vector.shape_cast %20 : vector<8xf32> to vector<8x1xf32>
      %22 = arith.mulf %19, %19 : vector<8x256xf32>
      %cst_20 = arith.constant dense<0.000000e+00> : vector<8xf32>
      %23 = vector.multi_reduction <add>, %22, %cst_20 [1] : vector<8x256xf32> to vector<8xf32>
      %24 = vector.shape_cast %23 : vector<8xf32> to vector<8x1xf32>
      %cst_21 = arith.constant 1.562500e-02 : f32
      %25 = vector.broadcast %cst_21 : f32 to vector<8x1xf32>
      %26 = arith.mulf %21, %25 : vector<8x1xf32>
      %cst_22 = arith.constant 1.562500e-02 : f32
      %27 = vector.broadcast %cst_22 : f32 to vector<8x1xf32>
      %28 = arith.mulf %24, %27 : vector<8x1xf32>
      %29 = arith.mulf %26, %26 : vector<8x1xf32>
      %30 = arith.subf %28, %29 : vector<8x1xf32>
      %cst_23 = arith.constant 0.000000e+00 : f32
      %31 = vector.broadcast %cst_23 : f32 to vector<8x1xf32>
      %32 = arith.maximumf %30, %31 : vector<8x1xf32>
      %cst_24 = arith.constant 9.99999974E-6 : f32
      %33 = vector.broadcast %cst_24 : f32 to vector<8x1xf32>
      %34 = arith.addf %32, %33 : vector<8x1xf32>
      %35 = math.rsqrt %34 : vector<8x1xf32>
      %36 = vector.broadcast %26 : vector<8x1xf32> to vector<8x256xf32>
      %37 = arith.subf %19, %36 : vector<8x256xf32>
      %38 = vector.broadcast %35 : vector<8x1xf32> to vector<8x256xf32>
      %39 = arith.mulf %37, %38 : vector<8x256xf32>
      %c0_25 = arith.constant 0 : index
      %c0_26 = arith.constant 0 : index
      %40 = vector.load %arg5[%c0_25, %c0_26] : memref<1x256xf32, #tpu.memory_space<vmem>>, vector<1x256xf32>
      %41 = vector.broadcast %40 : vector<1x256xf32> to vector<8x256xf32>
      %42 = arith.mulf %39, %41 : vector<8x256xf32>
      %c0_27 = arith.constant 0 : index
      %c0_28 = arith.constant 0 : index
      %43 = vector.load %arg6[%c0_27, %c0_28] : memref<1x256xf32, #tpu.memory_space<vmem>>, vector<1x256xf32>
      %44 = vector.broadcast %43 : vector<1x256xf32> to vector<8x256xf32>
      %45 = arith.addf %42, %44 : vector<8x256xf32>
      %c0_29 = arith.constant 0 : index
      %c0_30 = arith.constant 0 : index
      %46 = vector.load %arg7[%c0_29, %c0_30] : memref<8x256xf32, #tpu.memory_space<vmem>>, vector<8x256xf32>
      tpu.vector_store %arg7[%c0_29, %c0_30], %45 {strides = array<i32>} : memref<8x256xf32, #tpu.memory_space<vmem>>, vector<8x256xf32>,
    } else {
    }
    return
  }
  func.func @transform_0(%arg0: i32, %arg1: i32) -> (i32, i32) {
    %c0_i32 = arith.constant 0 : i32
    return %arg0, %arg1 : i32, i32
  }
  func.func @transform_1(%arg0: i32, %arg1: i32) -> (i32, i32) {
    %c0_i32 = arith.constant 0 : i32
    %c0_i32_0 = arith.constant 0 : i32
    return %arg1, %c0_i32 : i32, i32
  }
  func.func @transform_2(%arg0: i32, %arg1: i32) -> (i32, i32) {
    %c0_i32 = arith.constant 0 : i32
    %c0_i32_0 = arith.constant 0 : i32
    %c0_i32_1 = arith.constant 0 : i32
    return %c0_i32, %c0_i32_0 : i32, i32
  }
  func.func @transform_3(%arg0: i32, %arg1: i32) -> (i32, i32) {
    %c0_i32 = arith.constant 0 : i32
    %c0_i32_0 = arith.constant 0 : i32
    %c0_i32_1 = arith.constant 0 : i32
    return %c0_i32, %c0_i32_0 : i32, i32
  }
  func.func @transform_4(%arg0: i32, %arg1: i32) -> (i32, i32) {
    %c0_i32 = arith.constant 0 : i32
    %c0_i32_0 = arith.constant 0 : i32
    %c0_i32_1 = arith.constant 0 : i32
    return %c0_i32, %c0_i32_0 : i32, i32
  }
  func.func @transform_5(%arg0: i32, %arg1: i32) -> (i32, i32) {
    %c0_i32 = arith.constant 0 : i32
    %c0_i32_0 = arith.constant 0 : i32
    return %arg0, %c0_i32 : i32, i32
  }
}

</mosaic_0001>

<bundles_post_ra>
// kernel: linear_layer_forward.1
= control target key start
LH: loop header
LB: loop body
LE: loop exit
PB: predicated region body
PF: predicated region fallthrough
CT: control target
= control target key end

     0   :  { %s625_s18 = smov 0   ;;  %s627_s19 = smov 0   ;;  %s695_s0 = inlined_call_operand.vmem [shape: f32[16,32], index: 0, kind: input, shape index: {}]   ;;  %s696_s1 = inlined_call_operand.vmem [shape: f32[32,256], index: 1, kind: input, shape index: {}]   ;;  %s697_s2 = inlined_call_operand.vmem [shape: f32[1,256], index: 2, kind: input, shape index: {}]   ;;  %s698_s3 = inlined_call_operand.vmem [shape: f32[1,256], index: 3, kind: input, shape index: {}]   ;;  %s699_s4 = inlined_call_operand.vmem [shape: f32[1,256], index: 4, kind: input, shape index: {}]   ;;  %s700_s5 = inlined_call_operand.vmem [shape: f32[16,256], index: 5, kind: output, shape index: {}]  }
   0x1   :  { %s629_s20 = smov 0  }
   0x2 LB: > { %s27_s21 = sadd.s32 1, %s588_s19  ;;  %p527_p0 = scmp.ge.s32.totalorder %s592_s20, 1  ;;  %s592_s20 = sphi %s629_s20, %s15_s20   ;;  %s588_s19 = sphi %s627_s19, %s702_s19   ;;  %s584_s18 = sphi %s625_s18, %s701_s18  }
   0x3   : > { %p29_p1 = scmp.ge.s32.totalorder %s27_s21, 2  ;;  %p215_p2 = scmp.lt.s32.totalorder %s592_s20, 3 }
   0x5   : > { %s704_s21 = smov (%p29_p1, %s27_s21), 0  ;;  %p216_p3 = pnand %p527_p0, %p215_p2 }
   0x6   : > { %v280_v0 = vld [vmem:[%s696_s1 + $0x8] sm:$0xff] (!%p216_p3)  ;;  %v282_v1 = vld [vmem:[%s696_s1 + $0x18] sm:$0xff] (!%p216_p3)  ;;  %v279_v2 = vld [vmem:[%s696_s1] sm:$0xff] (!%p216_p3)  ;;  %p251_p4 = scmp.lt.s32.totalorder (!%p216_p3), %s584_s18, 1  ;;  %v594_v7 = vmov (!%p216_p3), 0.0   ;;  %vm287_vm0 = vcmask (!%p216_p3), 261120   ;;  %v373_v14 = vlaneseq (!%p216_p3) }
   0x7   : > { %219 = sbr.rel (%p216_p3) target bundleno = 409 (0x199), region = 40  ;;  %v535_v3 = vpack.c.bf16 (!%p216_p3), %v282_v1, %v280_v0  ;;  %v281_v4 = vld [vmem:[%s696_s1 + $0x10] sm:$0xff] (!%p216_p3)  ;;  %v284_v5 = vld [vmem:[%s696_s1 + $0x28] sm:$0xff] (!%p216_p3)  ;;  %v286_v6 = vld [vmem:[%s696_s1 + $0x38] sm:$0xff] (!%p216_p3)  ;;  %355 = vmatprep.mubr.f32.mxu0 (!%p216_p3), %v594_v7 }
   0x8   : > { %v537_v8 = vpack.c.bf16 (!%p216_p3), %v281_v4, %v279_v2  ;;  %v539_v9 = vpack.c.bf16 (!%p216_p3), %v286_v6, %v284_v5  ;;  %v283_v10 = vld [vmem:[%s696_s1 + $0x20] sm:$0xff] (!%p216_p3)  ;;  %v285_v11 = vld [vmem:[%s696_s1 + $0x30] sm:$0xff] (!%p216_p3)  ;;  %v374_v15 = vshrl.u32 (!%p216_p3), %v373_v14, 7 }
   0x9   : > { %536 = vmatprep.subr.bf16.mxu0 (!%p216_p3), %v535_v3  ;;  %v541_v12 = vpack.c.bf16 (!%p216_p3), %v285_v11, %v283_v10  ;;  %v371_v17 = vld [vmem:[%s697_s2] sm:$0x3] (!%p216_p3) }
   0xa   : > { %538 = vmatpush1.bf16.msra.mxu0 (!%p216_p3), %v537_v8  ;;  %v375_v16 = vsub.s32 (!%p216_p3), 0, %v374_v15  ;;  %v379_v18 = vsub.s32 (!%p216_p3), 1, %v374_v15  ;;  %v410_v39 = vld [vmem:[%s698_s3] sm:$0x3] (!%p216_p3) }
   0xb   : > { %540 = vmatprep.subr.bf16.mxu0 (!%p216_p3), %v539_v9  ;;  %v424_v40 = vld [vmem:[%s699_s4] sm:$0x3] (!%p216_p3) }
   0xc   : > { %v376_v19 = vrot.slane (!%p216_p3), %v371_v17, %v375_v16  ;;  %v380_v20 = vrot.slane (!%p216_p3), %v371_v17, %v379_v18  ;;  %v415_v41 = vrot.slane (!%p216_p3), %v410_v39, %v375_v16  ;;  %v419_v42 = vrot.slane (!%p216_p3), %v410_v39, %v379_v18 }
   0xd   : > { %v429_v46 = vrot.slane (!%p216_p3), %v424_v40, %v375_v16  ;;  %v433_v47 = vrot.slane (!%p216_p3), %v424_v40, %v379_v18 }
   0xe   : > { %s706_s18 = smov (!%p251_p4, %s584_s18), 1  ;;  %542 = vmatpush1.bf16.msra.mxu0 %v541_v12 }
   0xf   : > { %s528_s13 = sshll.u32 %s706_s18, 3  ;;  %s534_s27 = sshll.u32 %s706_s18, 4 }
  0x10   : > { %s257_s16 = scalar_lea.vmem %s695_s0, %s528_s13  ;;  %s269_s30 = scalar_lea.vmem %s700_s5, %s534_s27 }
  0x11   : > { %v278_v13 = vld [vmem:[%s257_s16] sm:$0xff] }
  0x12   : > { %531 = vmatmul.mubr.msk.f32.vlgmr.msra.gmra.mrb[0].mxu0 %vm287_vm0, %v278_v13 }
  0xe5   : > { %v357_v21 = vpop.f32.mrb[0].mxu0 }
  0xe6   : > { %v383_v22 = vadd.f32 %v376_v19, %v357_v21  ;;  %v359_v23 = vpop.f32.mrb[1].mxu0 }
  0xe7   : > { %v384_v24 = vadd.f32 %v380_v20, %v359_v23 }
  0xe8   : > { %v385_v25 = vmax.f32 %v383_v22, 0.0 }
  0xe9   : > { %v386_v26 = vmax.f32 %v384_v24, 0.0 }
  0xea   : > { %v394_v28 = vmul.f32 %v385_v25, %v385_v25 }
  0xeb   : > { %v391_v27 = vadd.f32 %v386_v26, %v385_v25  ;;  %v395_v29 = vmul.f32 %v386_v26, %v386_v26 }
  0xed   : > { %392 = vadd.xlane.f32.xlu0 %v391_v27  ;;  %v396_v30 = vadd.f32 %v395_v29, %v394_v28 }
  0xf1   : > { %397 = vadd.xlane.f32.xlu0 %v396_v30 }
 0x17a   : > { %v393_v31 = vpop.xlane.xlu0 %392 }
 0x17b   : > { %v399_v32 = vmul.f32 0.015625, %v393_v31 }
 0x17d   : > { %v401_v34 = vmul.f32 %v399_v32, %v399_v32  ;;  %v406_v43 = vsub.f32 %v385_v25, %v399_v32  ;;  %v407_v44 = vsub.f32 %v386_v26, %v399_v32 }
 0x17e   : > { %v398_v33 = vpop.xlane.xlu0 %397 }
 0x17f   : > { %v400_v35 = vmul.f32 0.015625, %v398_v33 }
 0x181   : > { %v402_v36 = vsub.f32 %v400_v35, %v401_v34 }
 0x183   : > { %v403_v37 = vmax.f32 %v402_v36, 0.0 }
 0x185   : > { %v404_v38 = vadd.f32 1e-05, %v403_v37 }
 0x187   : > { %568 = vrsqrt.f32 %v404_v38 }
 0x191   : > { %v569_v45 = vpop.eup %568 }
 0x192   : > { %v408_v48 = vmul.f32 %v569_v45, %v406_v43  ;;  %v409_v49 = vmul.f32 %v569_v45, %v407_v44 }
 0x194   : > { %v422_v50 = vmul.f32 %v415_v41, %v408_v48  ;;  %v423_v51 = vmul.f32 %v419_v42, %v409_v49 }
 0x196   : > { %v436_v52 = vadd.f32 %v429_v46, %v422_v50  ;;  %v437_v53 = vadd.f32 %v433_v47, %v423_v51 }
 0x198   : > { %438 = vst [vmem:[%s269_s30] sm:$0xff] %v436_v52  ;;  %439 = vst [vmem:[%s269_s30 + $0x8] sm:$0xff] %v437_v53 }
 0x199 PF: > { %s15_s20 = sadd.s32 1, %s592_s20   ;;  %s701_s18 = smov %s588_s19 }
 0x19a   : > { %p12_p5 = scmp.ge.s32.totalorder %s15_s20, 4   ;;  %s702_s19 = smov %s704_s21 }
 0x19c   :  { %14 = sbr.rel (!%p12_p5) target bundleno = 2 (0x2), region = 81 }

</bundles_post_ra>
